<compile_context>
chip_gen: v7x
topology: tpu7x:2x2x1
jax: 0.10.0
libtpu: 0.0.40
codegen_flags: <defaults>
</compile_context>

<pallas_src>
import functools

import jax
import jax.numpy as jnp
from jax.experimental import pallas as pl
from jax.experimental.pallas import tpu as pltpu


def get_layer_sizes_for_autoencoder(input_size=10, num_layers_in_half=2):
    layer_sizes = []
    size = input_size
    for i in range(num_layers_in_half):
        layer_sizes.append(size // 2)
        size = size // 2
    layer_sizes += layer_sizes[:-1][::-1]
    layer_sizes.insert(0, input_size)
    layer_sizes.append(input_size)
    return layer_sizes


def _sigmoid_f32(x):
    # exp on the EUP; pl.reciprocal keeps the 1/x off the VPU divide path.
    return pl.reciprocal(1.0 + jnp.exp(-x))


def autoencoder_kernel(x_ref,
                       w1_ref, b1_ref,
                       w2_ref, b2_ref,
                       w3_ref, b3_ref,
                       w4_ref, b4_ref,
                       o_ref):
    # Transposed layout: activations are (features, batch_tile) so batch maps
    # to the 128-lane axis. Weights are (out, in): each layer is W @ h + b.
    x = x_ref[...]

    h = jnp.dot(w1_ref[...], x, preferred_element_type=jnp.float32) + b1_ref[...]
    h = _sigmoid_f32(h).astype(w2_ref.dtype)

    h = jnp.dot(w2_ref[...], h, preferred_element_type=jnp.float32) + b2_ref[...]
    h = _sigmoid_f32(h).astype(w3_ref.dtype)

    h = jnp.dot(w3_ref[...], h, preferred_element_type=jnp.float32) + b3_ref[...]
    h = _sigmoid_f32(h).astype(w4_ref.dtype)

    # Last layer has no activation (matches the PyTorch module).
    h = jnp.dot(w4_ref[...], h, preferred_element_type=jnp.float32) + b4_ref[...]

    o_ref[...] = h.astype(o_ref.dtype)


def _pick_batch_tile(B, batch_tile):
    """Largest 128-multiple tile <= batch_tile that doesn't over-pad B."""
    b128 = int(pl.cdiv(B, 128)) * 128          # lane-align the batch
    tb = max(128, (int(batch_tile) // 128) * 128)
    tb = min(tb, b128)
    # Make the padded batch an exact multiple of the tile.
    b_pad = int(pl.cdiv(b128, tb)) * tb
    return tb, b_pad


@functools.partial(jax.jit, static_argnames=("batch_tile", "compute_dtype"))
def autoencoder_forward(x, params, *, batch_tile=512, compute_dtype=jnp.float32):
    """x: (B, D) float32; params: list of (W (out,in), b (out,)) per layer.

    compute_dtype=jnp.bfloat16 is recommended on v6e/v7x (accumulation stays
    f32 via preferred_element_type); f32 is the safe default used here.
    """
    B, D = x.shape
    TB, B_pad = _pick_batch_tile(B, batch_tile)

    # Transpose once in the wrapper (not per-layer in the kernel).
    x_t = jnp.transpose(x)                      # (D, B)
    if B_pad != B:
        x_t = jnp.pad(x_t, ((0, 0), (0, B_pad - B)))
    x_t = x_t.astype(compute_dtype)

    flat_args = [x_t]
    in_specs = [pl.BlockSpec((D, TB), lambda i: (0, i))]
    for w, b in params:
        out_f, in_f = w.shape
        flat_args.append(w.astype(compute_dtype))
        # Constant index_map -> weight/bias blocks stay VMEM-resident across
        # all batch tiles (no re-DMA per grid step).
        in_specs.append(pl.BlockSpec((out_f, in_f), lambda i: (0, 0)))
        flat_args.append(b.reshape(out_f, 1).astype(jnp.float32))
        in_specs.append(pl.BlockSpec((out_f, 1), lambda i: (0, 0)))

    out_specs = pl.BlockSpec((D, TB), lambda i: (0, i))
    grid = (B_pad // TB,)

    # Advisory cost estimate for XLA's scheduler.
    sizes = [D] + [int(w.shape[0]) for w, _ in params]
    flops = 2 * B_pad * sum(a * b for a, b in zip(sizes[:-1], sizes[1:]))
    transcendentals = B_pad * sum(sizes[1:-1])          # one exp per hidden act
    bytes_accessed = int(
        B_pad * D * jnp.dtype(compute_dtype).itemsize          # x read
        + B_pad * D * jnp.dtype(x.dtype).itemsize               # out write
        + sum(int(w.size) * jnp.dtype(compute_dtype).itemsize
              + int(b.size) * 4 for w, b in params)
    )

    out_t = pl.pallas_call(
        autoencoder_kernel,
        out_shape=jax.ShapeDtypeStruct((D, B_pad), x.dtype),
        grid=grid,
        in_specs=in_specs,
        out_specs=out_specs,
        compiler_params=pltpu.CompilerParams(
            # Batch tiles are independent -> shard across v7x's 2 TensorCores.
            dimension_semantics=("parallel",),
        ),
        cost_estimate=pl.CostEstimate(
            flops=flops,
            transcendentals=transcendentals,
            bytes_accessed=bytes_accessed,
        ),
    )(*flat_args)

    # Undo the wrapper transpose / padding.
    return jnp.transpose(out_t)[:B, :]


def init_params(layer_sizes, key):
    """Deterministic init mimicking nn.Linear's U(-1/sqrt(in), 1/sqrt(in)).

    Weights kept in PyTorch layout (out_features, in_features).
    """
    params = []
    for i in range(len(layer_sizes) - 1):
        fan_in, fan_out = layer_sizes[i], layer_sizes[i + 1]
        key, kw, kb = jax.random.split(key, 3)
        bound = 1.0 / jnp.sqrt(jnp.float32(fan_in))
        w = jax.random.uniform(kw, (fan_out, fan_in), jnp.float32, -bound, bound)
        b = jax.random.uniform(kb, (fan_out,), jnp.float32, -bound, bound)
        params.append((w, b))
    return params


def reference_forward(x, params):
    h = x
    n = len(params)
    for i, (w, b) in enumerate(params):
        h = h @ w.T + b
        if i != n - 1:
            h = jax.nn.sigmoid(h)
    return h


if __name__ == "__main__":
    key = jax.random.PRNGKey(0)

    D = 32                       # X.shape[1]
    B = 256                      # batch
    layer_sizes = get_layer_sizes_for_autoencoder(D, 2)   # [32, 16, 8, 16, 32]

    key, kx = jax.random.split(key)
    x = jax.random.normal(kx, (B, D), jnp.float32)
    params = init_params(layer_sizes, key)

    out = autoencoder_forward(x, params, batch_tile=512,
                              compute_dtype=jnp.float32)
    out = jax.block_until_ready(out)

    ref = reference_forward(x, params)
    assert out.shape == (B, D)
    assert jnp.allclose(out, ref, atol=1e-5, rtol=1e-5), "mismatch vs reference"

    # Exercise the ragged-batch / padding path with a small odd batch.
    key, kx2 = jax.random.split(key)
    x2 = jax.random.normal(kx2, (70, D), jnp.float32)
    out2 = jax.block_until_ready(autoencoder_forward(x2, params))
    assert out2.shape == (70, D)
    assert jnp.allclose(out2, reference_forward(x2, params), atol=1e-5, rtol=1e-5)

    print("KERNEL_OK")
</pallas_src>

<mosaic_0001>
module attributes {stable_mosaic.version = 11 : i64} {
  func.func @autoencoder_kernel(%arg0: i32, %arg1: memref<32x256xf32, #tpu.memory_space<vmem>>, %arg2: memref<16x32xf32, #tpu.memory_space<vmem>>, %arg3: memref<16x1xf32, #tpu.memory_space<vmem>>, %arg4: memref<8x16xf32, #tpu.memory_space<vmem>>, %arg5: memref<8x1xf32, #tpu.memory_space<vmem>>, %arg6: memref<16x8xf32, #tpu.memory_space<vmem>>, %arg7: memref<16x1xf32, #tpu.memory_space<vmem>>, %arg8: memref<32x16xf32, #tpu.memory_space<vmem>>, %arg9: memref<32x1xf32, #tpu.memory_space<vmem>>, %arg10: memref<32x256xf32, #tpu.memory_space<vmem>>) attributes {dimension_semantics = [#tpu.dimension_semantics<parallel>], iteration_bounds = array<i64: 1>, scalar_prefetch = 0 : i64, scratch_operands = 0 : i64, tpu.core_type = #tpu.core_type<tc>, window_params = [{transform_indices = @transform_0, window_bounds = array<i64: 32, 256>}, {pipeline_mode = #tpu.pipeline_mode<synchronous>, transform_indices = @transform_1, window_bounds = array<i64: 16, 32>}, {pipeline_mode = #tpu.pipeline_mode<synchronous>, transform_indices = @transform_2, window_bounds = array<i64: 16, 1>}, {pipeline_mode = #tpu.pipeline_mode<synchronous>, transform_indices = @transform_3, window_bounds = array<i64: 8, 16>}, {pipeline_mode = #tpu.pipeline_mode<synchronous>, transform_indices = @transform_4, window_bounds = array<i64: 8, 1>}, {pipeline_mode = #tpu.pipeline_mode<synchronous>, transform_indices = @transform_5, window_bounds = array<i64: 16, 8>}, {pipeline_mode = #tpu.pipeline_mode<synchronous>, transform_indices = @transform_6, window_bounds = array<i64: 16, 1>}, {pipeline_mode = #tpu.pipeline_mode<synchronous>, transform_indices = @transform_7, window_bounds = array<i64: 32, 16>}, {pipeline_mode = #tpu.pipeline_mode<synchronous>, transform_indices = @transform_8, window_bounds = array<i64: 32, 1>}, {transform_indices = @transform_9, window_bounds = array<i64: 32, 256>}]} {
    %c0 = arith.constant 0 : index
    %c0_0 = arith.constant 0 : index
    %0 = vector.load %arg1[%c0, %c0_0] : memref<32x256xf32, #tpu.memory_space<vmem>>, vector<32x256xf32>
    %c0_1 = arith.constant 0 : index
    %c0_2 = arith.constant 0 : index
    %1 = vector.load %arg2[%c0_1, %c0_2] : memref<16x32xf32, #tpu.memory_space<vmem>>, vector<16x32xf32>
    %cst = arith.constant dense<0.000000e+00> : vector<16x256xf32>
    %2 = tpu.matmul %1, %0, %cst {dimension_numbers = #tpu.dot_dimension_numbers<[1], [0], [0], [1], [0, 0, 1, 1], [], []>} : vector<16x32xf32>, vector<32x256xf32>, vector<16x256xf32> -> vector<16x256xf32>
    %c0_3 = arith.constant 0 : index
    %c0_4 = arith.constant 0 : index
    %3 = vector.load %arg3[%c0_3, %c0_4] : memref<16x1xf32, #tpu.memory_space<vmem>>, vector<16x1xf32>
    %4 = vector.broadcast %3 : vector<16x1xf32> to vector<16x256xf32>
    %5 = arith.addf %2, %4 : vector<16x256xf32>
    %cst_5 = arith.constant 0.000000e+00 : f32
    %6 = vector.broadcast %cst_5 : f32 to vector<16x256xf32>
    %7 = arith.subf %6, %5 : vector<16x256xf32>
    %8 = math.exp %7 : vector<16x256xf32>
    %cst_6 = arith.constant 1.000000e+00 : f32
    %9 = vector.broadcast %cst_6 : f32 to vector<16x256xf32>
    %10 = arith.addf %9, %8 : vector<16x256xf32>
    %11 = tpu.reciprocal %10 : vector<16x256xf32> -> vector<16x256xf32>
    %c0_7 = arith.constant 0 : index
    %c0_8 = arith.constant 0 : index
    %12 = vector.load %arg4[%c0_7, %c0_8] : memref<8x16xf32, #tpu.memory_space<vmem>>, vector<8x16xf32>
    %cst_9 = arith.constant dense<0.000000e+00> : vector<8x256xf32>
    %13 = tpu.matmul %12, %11, %cst_9 {dimension_numbers = #tpu.dot_dimension_numbers<[1], [0], [0], [1], [0, 0, 1, 1], [], []>} : vector<8x16xf32>, vector<16x256xf32>, vector<8x256xf32> -> vector<8x256xf32>
    %c0_10 = arith.constant 0 : index
    %c0_11 = arith.constant 0 : index
    %14 = vector.load %arg5[%c0_10, %c0_11] : memref<8x1xf32, #tpu.memory_space<vmem>>, vector<8x1xf32>
    %15 = vector.broadcast %14 : vector<8x1xf32> to vector<8x256xf32>
    %16 = arith.addf %13, %15 : vector<8x256xf32>
    %cst_12 = arith.constant 0.000000e+00 : f32
    %17 = vector.broadcast %cst_12 : f32 to vector<8x256xf32>
    %18 = arith.subf %17, %16 : vector<8x256xf32>
    %19 = math.exp %18 : vector<8x256xf32>
    %cst_13 = arith.constant 1.000000e+00 : f32
    %20 = vector.broadcast %cst_13 : f32 to vector<8x256xf32>
    %21 = arith.addf %20, %19 : vector<8x256xf32>
    %22 = tpu.reciprocal %21 : vector<8x256xf32> -> vector<8x256xf32>
    %c0_14 = arith.constant 0 : index
    %c0_15 = arith.constant 0 : index
    %23 = vector.load %arg6[%c0_14, %c0_15] : memref<16x8xf32, #tpu.memory_space<vmem>>, vector<16x8xf32>
    %cst_16 = arith.constant dense<0.000000e+00> : vector<16x256xf32>
    %24 = tpu.matmul %23, %22, %cst_16 {dimension_numbers = #tpu.dot_dimension_numbers<[1], [0], [0], [1], [0, 0, 1, 1], [], []>} : vector<16x8xf32>, vector<8x256xf32>, vector<16x256xf32> -> vector<16x256xf32>
    %c0_17 = arith.constant 0 : index
    %c0_18 = arith.constant 0 : index
    %25 = vector.load %arg7[%c0_17, %c0_18] : memref<16x1xf32, #tpu.memory_space<vmem>>, vector<16x1xf32>
    %26 = vector.broadcast %25 : vector<16x1xf32> to vector<16x256xf32>
    %27 = arith.addf %24, %26 : vector<16x256xf32>
    %cst_19 = arith.constant 0.000000e+00 : f32
    %28 = vector.broadcast %cst_19 : f32 to vector<16x256xf32>
    %29 = arith.subf %28, %27 : vector<16x256xf32>
    %30 = math.exp %29 : vector<16x256xf32>
    %cst_20 = arith.constant 1.000000e+00 : f32
    %31 = vector.broadcast %cst_20 : f32 to vector<16x256xf32>
    %32 = arith.addf %31, %30 : vector<16x256xf32>
    %33 = tpu.reciprocal %32 : vector<16x256xf32> -> vector<16x256xf32>
    %c0_21 = arith.constant 0 : index
    %c0_22 = arith.constant 0 : index
    %34 = vector.load %arg8[%c0_21, %c0_22] : memref<32x16xf32, #tpu.memory_space<vmem>>, vector<32x16xf32>
    %cst_23 = arith.constant dense<0.000000e+00> : vector<32x256xf32>
    %35 = tpu.matmul %34, %33, %cst_23 {dimension_numbers = #tpu.dot_dimension_numbers<[1], [0], [0], [1], [0, 0, 1, 1], [], []>} : vector<32x16xf32>, vector<16x256xf32>, vector<32x256xf32> -> vector<32x256xf32>
    %c0_24 = arith.constant 0 : index
    %c0_25 = arith.constant 0 : index
    %36 = vector.load %arg9[%c0_24, %c0_25] : memref<32x1xf32, #tpu.memory_space<vmem>>, vector<32x1xf32>
    %37 = vector.broadcast %36 : vector<32x1xf32> to vector<32x256xf32>
    %38 = arith.addf %35, %37 : vector<32x256xf32>
    %c0_26 = arith.constant 0 : index
    %c0_27 = arith.constant 0 : index
    %39 = vector.load %arg10[%c0_26, %c0_27] : memref<32x256xf32, #tpu.memory_space<vmem>>, vector<32x256xf32>
    tpu.vector_store %arg10[%c0_26, %c0_27], %38 {strides = array<i32>} : memref<32x256xf32, #tpu.memory_space<vmem>>, vector<32x256xf32>,
    return
  }
  func.func @transform_0(%arg0: i32) -> (i32, i32) {
    %c0_i32 = arith.constant 0 : i32
    %c0_i32_0 = arith.constant 0 : i32
    return %c0_i32, %arg0 : i32, i32
  }
  func.func @transform_1(%arg0: i32) -> (i32, i32) {
    %c0_i32 = arith.constant 0 : i32
    %c0_i32_0 = arith.constant 0 : i32
    %c0_i32_1 = arith.constant 0 : i32
    return %c0_i32, %c0_i32_0 : i32, i32
  }
  func.func @transform_2(%arg0: i32) -> (i32, i32) {
    %c0_i32 = arith.constant 0 : i32
    %c0_i32_0 = arith.constant 0 : i32
    %c0_i32_1 = arith.constant 0 : i32
    return %c0_i32, %c0_i32_0 : i32, i32
  }
  func.func @transform_3(%arg0: i32) -> (i32, i32) {
    %c0_i32 = arith.constant 0 : i32
    %c0_i32_0 = arith.constant 0 : i32
    %c0_i32_1 = arith.constant 0 : i32
    return %c0_i32, %c0_i32_0 : i32, i32
  }
  func.func @transform_4(%arg0: i32) -> (i32, i32) {
    %c0_i32 = arith.constant 0 : i32
    %c0_i32_0 = arith.constant 0 : i32
    %c0_i32_1 = arith.constant 0 : i32
    return %c0_i32, %c0_i32_0 : i32, i32
  }
  func.func @transform_5(%arg0: i32) -> (i32, i32) {
    %c0_i32 = arith.constant 0 : i32
    %c0_i32_0 = arith.constant 0 : i32
    %c0_i32_1 = arith.constant 0 : i32
    return %c0_i32, %c0_i32_0 : i32, i32
  }
  func.func @transform_6(%arg0: i32) -> (i32, i32) {
    %c0_i32 = arith.constant 0 : i32
    %c0_i32_0 = arith.constant 0 : i32
    %c0_i32_1 = arith.constant 0 : i32
    return %c0_i32, %c0_i32_0 : i32, i32
  }
  func.func @transform_7(%arg0: i32) -> (i32, i32) {
    %c0_i32 = arith.constant 0 : i32
    %c0_i32_0 = arith.constant 0 : i32
    %c0_i32_1 = arith.constant 0 : i32
    return %c0_i32, %c0_i32_0 : i32, i32
  }
  func.func @transform_8(%arg0: i32) -> (i32, i32) {
    %c0_i32 = arith.constant 0 : i32
    %c0_i32_0 = arith.constant 0 : i32
    %c0_i32_1 = arith.constant 0 : i32
    return %c0_i32, %c0_i32_0 : i32, i32
  }
  func.func @transform_9(%arg0: i32) -> (i32, i32) {
    %c0_i32 = arith.constant 0 : i32
    %c0_i32_0 = arith.constant 0 : i32
    return %c0_i32, %arg0 : i32, i32
  }
}

</mosaic_0001>

<bundles_post_ra>
// kernel: autoencoder_forward.1
= control target key start
LH: loop header
LB: loop body
LE: loop exit
PB: predicated region body
PF: predicated region fallthrough
CT: control target
= control target key end

     0   :  { %v620_v7 = vmov 0.0   ;;  %v621_v8 = vmov 0   ;;  %s779_s0 = inlined_call_operand.vmem [shape: f32[32,256], index: 0, kind: input, shape index: {}]   ;;  %s780_s1 = inlined_call_operand.vmem [shape: f32[16,32], index: 1, kind: input, shape index: {}]   ;;  %s781_s2 = inlined_call_operand.vmem [shape: f32[16,1], index: 2, kind: input, shape index: {}]   ;;  %s782_s3 = inlined_call_operand.vmem [shape: f32[8,16], index: 3, kind: input, shape index: {}]   ;;  %s783_s4 = inlined_call_operand.vmem [shape: f32[8,1], index: 4, kind: input, shape index: {}]   ;;  %s784_s5 = inlined_call_operand.vmem [shape: f32[16,8], index: 5, kind: input, shape index: {}]   ;;  %s785_s6 = inlined_call_operand.vmem [shape: f32[16,1], index: 6, kind: input, shape index: {}]   ;;  %s786_s7 = inlined_call_operand.vmem [shape: f32[32,16], index: 7, kind: input, shape index: {}]   ;;  %s787_s8 = inlined_call_operand.vmem [shape: f32[32,1], index: 8, kind: input, shape index: {}]   ;;  %s788_s9 = inlined_call_operand.hbm [shape: f32[32,256], index: 9, kind: output, shape index: {}]  }
   0x1   :  { %v34_v0 = vld [vmem:[%s779_s0 + $0x8] sm:$0xff]  ;;  %v36_v1 = vld [vmem:[%s779_s0 + $0x18] sm:$0xff]  ;;  %v33_v2 = vld [vmem:[%s779_s0] sm:$0xff]  ;;  %126 = vmatprep.mubr.f32.mxu0 %v620_v7  ;;  %554 = vset.pattern.permute.xlu0 %v621_v8 }
   0x2   :  { %v531_v3 = vpack.c.bf16 %v36_v1, %v34_v0  ;;  %v35_v4 = vld [vmem:[%s779_s0 + $0x10] sm:$0xff]  ;;  %v38_v5 = vld [vmem:[%s779_s0 + $0x28] sm:$0xff]  ;;  %v40_v6 = vld [vmem:[%s779_s0 + $0x38] sm:$0xff]  ;;  %234 = vmatprep.mubr.f32.mxu1 %v620_v7  ;;  %555 = vset.pattern.permute.xlu1 %v621_v8 }
   0x3   :  { %v533_v9 = vpack.c.bf16 %v35_v4, %v33_v2  ;;  %v535_v10 = vpack.c.bf16 %v40_v6, %v38_v5  ;;  %v37_v11 = vld [vmem:[%s779_s0 + $0x20] sm:$0xff]  ;;  %v39_v12 = vld [vmem:[%s779_s0 + $0x30] sm:$0xff]  ;;  %v44_v15 = vld [vmem:[%s781_s2 + $0x8] sm:$0xff] }
   0x4   :  { %532 = vmatprep.subr.bf16.mxu0 %v531_v3  ;;  %v43_v13 = vld [vmem:[%s781_s2] sm:$0xff]  ;;  %v537_v14 = vpack.c.bf16 %v39_v12, %v37_v11 }
   0x5   :  { %534 = vmatpush1.bf16.msra.mxu0 %v533_v9  ;;  %47 = vperm.xlu0 %554, %v43_v13  }
   0x6   :  { %536 = vmatprep.subr.bf16.mxu0 %v535_v10 }
   0x7   :  { %14 = vsyncpa [#allocation3], 0  ;;  %v41_v16 = vld [vmem:[%s780_s1] sm:$0xff]  ;;  %vm55_vm0 = vcmask 261120   ;;  %v254_v17 = vld [vmem:[%s785_s6 + $0x8] sm:$0xff]  ;;  %vm166_vm1 = vcmask 130048  }
   0x8   :  { %v42_v18 = vld [vmem:[%s780_s1 + $0x8] sm:$0xff]  ;;  %v376_v20 = vld [vmem:[%s787_s8 + $0x18] sm:$0xff]  ;;  %v160_v21 = vld [vmem:[%s783_s4] sm:$0xff]  ;;  %vm265_vm2 = vcmask 64512   ;;  %s622_s10 = smov [#allocation2]  }
   0x9   :  { %538 = vmatpush1.bf16.msra.mxu0 %v537_v14  ;;  %52 = vperm.xlu0 %554, %v44_v15   ;;  %v374_v19 = vld [vmem:[%s787_s8 + $0x8] sm:$0xff]  ;;  %v253_v22 = vld [vmem:[%s785_s6] sm:$0xff]  ;;  %v375_v24 = vld [vmem:[%s787_s8 + $0x10] sm:$0xff]  ;;  %s511_s11 = sshll.u32 %s622_s10, 4  ;;  %s512_s11 = int_to_ptr.vmem [resolvable:$true] %s511_s11 }
   0xa   :  { %163 = vperm.xlu1 %555, %v160_v21   ;;  %v373_v23 = vld [vmem:[%s787_s8] sm:$0xff]  ;;  %v252_v11 = vld [vmem:[%s784_s5 + $0x8] sm:$0xff]  ;;  %p601_p1 = scmp.lt.s32.totalorder %s512_s11, %s512_s11 }
   0xb   :  { %v159_v57 = vld [vmem:[%s782_s3] sm:$0xff] }
   0xc   :  { %522 = vmatmul.mubr.msk.f32.vlgmr.msra.gmra.mrb[0].mxu0 %vm55_vm0, %v41_v16  ;;  %v251_v9 = vld [vmem:[%s784_s5] sm:$0xff] }
   0xd   :  { %132 = vmatprep.mubr.f32.mxu0 %v620_v7  ;;  %262 = vperm.xlu0 %554, %v254_v17  }
   0xe   :  { %257 = vperm.xlu1 %555, %v253_v22  }
  0x10   :  { %523 = vmatmul.mubr.msk.f32.gmra.mrb[2].mxu0 %vm55_vm0, %v42_v18 }
  0x11   :  { %384 = vperm.xlu0 %554, %v374_v19   ;;  %473 = vmatprep.mubr.f32.mxu0 %v620_v7 }
  0x12   :  { %379 = vperm.xlu1 %555, %v373_v23  }
  0x15   :  { %394 = vperm.xlu0 %554, %v376_v20  }
  0x16   :  { %389 = vperm.xlu1 %555, %v375_v24  }
  0x84   :  { %v48_v25 = vpop.permute.xlu0 %47 }
  0x88   :  { %v53_v31 = vpop.permute.xlu0 %52 }
  0x89   :  { %v164_v58 = vpop.permute.xlu1 %163 }
  0x8c   :  { %v263_v18 = vpop.permute.xlu0 %262 }
  0x8d   :  { %v258_v12 = vpop.permute.xlu1 %257 }
  0xdf   :  { %v128_v26 = vpop.f32.mrb[0].mxu0 }
  0xe0   :  { %v129_v27 = vadd.f32 %v128_v26, %v48_v25  ;;  %v130_v28 = vpop.f32.mrb[1].mxu0 }
  0xe1   :  { %v131_v29 = vadd.f32 %v130_v28, %v48_v25 }
  0xe2   :  { %v139_v30 = vsub.f32 0.0, %v129_v27 }
  0xe3   :  { %v140_v32 = vsub.f32 0.0, %v131_v29  ;;  %v134_v33 = vpop.f32.mrb[2].mxu0 }
  0xe4   :  { %v143_v34 = vmul.f32 1.442695, %v139_v30  ;;  %v135_v35 = vadd.f32 %v134_v33, %v53_v31  ;;  %v136_v36 = vpop.f32.mrb[3].mxu0 }
  0xe5   :  { %v145_v37 = vmul.f32 1.442695, %v140_v32  ;;  %v137_v38 = vadd.f32 %v136_v36, %v53_v31 }
  0xe6   :  { %556 = vpow2.f32 %v143_v34  ;;  %v141_v39 = vsub.f32 0.0, %v135_v35 }
  0xe7   :  { %558 = vpow2.f32 %v145_v37  ;;  %v142_v40 = vsub.f32 0.0, %v137_v38 }
  0xe8   :  { %v147_v41 = vmul.f32 1.442695, %v141_v39 }
  0xe9   :  { %v149_v42 = vmul.f32 1.442695, %v142_v40 }
  0xea   :  { %560 = vpow2.f32 %v147_v41 }
  0xeb   :  { %562 = vpow2.f32 %v149_v42 }
  0xf0   :  { %v557_v43 = vpop.eup %556 }
  0xf1   :  { %v559_v44 = vpop.eup %558  ;;  %v151_v45 = vadd.f32 1.0, %v557_v43 }
  0xf2   :  { %v152_v46 = vadd.f32 1.0, %v559_v44  ;;  %v369_v44 = vld [vmem:[%s786_s7] sm:$0xff] }
  0xf3   :  { %564 = vrcp.f32 %v151_v45  ;;  %v371_v45 = vld [vmem:[%s786_s7 + $0x10] sm:$0xff] }
  0xf4   :  { %v561_v47 = vpop.eup %560  ;;  %566 = vrcp.f32 %v152_v46  ;;  %v370_v46 = vld [vmem:[%s786_s7 + $0x8] sm:$0xff] }
  0xf5   :  { %v563_v48 = vpop.eup %562  ;;  %v153_v49 = vadd.f32 1.0, %v561_v47  ;;  %v372_v47 = vld [vmem:[%s786_s7 + $0x18] sm:$0xff]  ;;  %s596_s7 = scalar_lea.vmem %s512_s11, 1024 }
  0xf6   :  { %v154_v50 = vadd.f32 1.0, %v563_v48  ;;  %v380_v48 = vpop.permute.xlu1 %379  ;;  %p597_p0 = scmp.ne.s32.totalorder %s512_s11, %s596_s7  ;;  %p602_p2 = scmp.lt.s32.totalorder %s596_s7, %s596_s7 }
  0xf7   :  { %568 = vrcp.f32 %v153_v49  ;;  %v385_v49 = vpop.permute.xlu0 %384 }
  0xf8   :  { %570 = vrcp.f32 %v154_v50  ;;  %p603_p3 = por %p602_p2, %p601_p1 }
  0xfa   :  { %v390_v50 = vpop.permute.xlu1 %389  ;;  %p604_p4 = pnand %p603_p3, %p597_p0 }
  0xfd   :  { %v565_v51 = vpop.eup %564 }
  0xfe   :  { %v567_v52 = vpop.eup %566 }
 0x101   :  { %v569_v53 = vpop.eup %568 }
 0x102   :  { %v571_v54 = vpop.eup %570  ;;  %v541_v55 = vpack.c.bf16 %v569_v53, %v565_v51 }
 0x103   :  { %v539_v56 = vpack.c.bf16 %v571_v54, %v567_v52 }
 0x105   :  { %540 = vmatprep.subr.bf16.mxu1 %v539_v56 }
 0x106   :  { %542 = vmatpush1.bf16.msra.mxu1 %v541_v55 }
 0x109   :  { %524 = vmatmul.mubr.msk.f32.vlgmr.msra.gmra.mrb[0].mxu1 %vm166_vm1, %v159_v57 }
 0x10a   :  { %336 = vmatprep.mubr.f32.mxu1 %v620_v7 }
 0x1dc   :  { %v236_v59 = vpop.f32.mrb[0].mxu1 }
 0x1dd   :  { %v237_v60 = vadd.f32 %v236_v59, %v164_v58  ;;  %v238_v61 = vpop.f32.mrb[1].mxu1 }
 0x1de   :  { %v239_v62 = vadd.f32 %v238_v61, %v164_v58  ;;  %v395_v58 = vpop.permute.xlu0 %394 }
 0x1df   :  { %v241_v63 = vsub.f32 0.0, %v237_v60 }
 0x1e0   :  { %v242_v0 = vsub.f32 0.0, %v239_v62 }
 0x1e1   :  { %v243_v1 = vmul.f32 1.442695, %v241_v63 }
 0x1e2   :  { %v245_v2 = vmul.f32 1.442695, %v242_v0 }
 0x1e3   :  { %572 = vpow2.f32 %v243_v1 }
 0x1e4   :  { %574 = vpow2.f32 %v245_v2 }
 0x1ed   :  { %v573_v3 = vpop.eup %572 }
 0x1ee   :  { %v575_v4 = vpop.eup %574  ;;  %v247_v5 = vadd.f32 1.0, %v573_v3 }
 0x1ef   :  { %v248_v6 = vadd.f32 1.0, %v575_v4 }
 0x1f1   :  { %576 = vrcp.f32 %v248_v6 }
 0x1f2   :  { %578 = vrcp.f32 %v247_v5 }
 0x1fb   :  { %v577_v8 = vpop.eup %576 }
 0x1fc   :  { %v579_v10 = vpop.eup %578  ;;  %272 = vmatprep.subr.mxu1 %v577_v8 }
 0x1fd   :  { %273 = vmatpush1.msra.mxu1 %v579_v10 }
 0x1fe   :  { %525 = vmatmul.mubr.msk.f32.vlgmr.msra.gmra.mrb[2].mxu1 %vm265_vm2, %v251_v9 }
 0x1ff   :  { %342 = vmatprep.mubr.f32.mxu1 %v620_v7 }
 0x202   :  { %526 = vmatmul.mubr.msk.f32.gmra.mrb[4].mxu1 %vm265_vm2, %v252_v11 }
 0x203   :  { %485 = vmatprep.mubr.f32.mxu1 %v620_v7 }
 0x2d1   :  { %v338_v13 = vpop.f32.mrb[2].mxu1 }
 0x2d2   :  { %v339_v14 = vadd.f32 %v338_v13, %v258_v12  ;;  %v340_v15 = vpop.f32.mrb[3].mxu1 }
 0x2d3   :  { %v341_v16 = vadd.f32 %v340_v15, %v258_v12 }
 0x2d4   :  { %v349_v17 = vsub.f32 0.0, %v339_v14 }
 0x2d5   :  { %v350_v19 = vsub.f32 0.0, %v341_v16  ;;  %v344_v20 = vpop.f32.mrb[4].mxu1 }
 0x2d6   :  { %v353_v21 = vmul.f32 1.442695, %v349_v17  ;;  %v345_v22 = vadd.f32 %v344_v20, %v263_v18  ;;  %v346_v23 = vpop.f32.mrb[5].mxu1 }
 0x2d7   :  { %v355_v24 = vmul.f32 1.442695, %v350_v19  ;;  %v347_v25 = vadd.f32 %v346_v23, %v263_v18 }
 0x2d8   :  { %580 = vpow2.f32 %v353_v21  ;;  %v351_v26 = vsub.f32 0.0, %v345_v22 }
 0x2d9   :  { %582 = vpow2.f32 %v355_v24  ;;  %v352_v27 = vsub.f32 0.0, %v347_v25 }
 0x2da   :  { %v357_v28 = vmul.f32 1.442695, %v351_v26 }
 0x2db   :  { %v359_v29 = vmul.f32 1.442695, %v352_v27 }
 0x2dc   :  { %584 = vpow2.f32 %v357_v28 }
 0x2dd   :  { %586 = vpow2.f32 %v359_v29 }
 0x2e2   :  { %v581_v30 = vpop.eup %580 }
 0x2e3   :  { %v583_v31 = vpop.eup %582  ;;  %v361_v32 = vadd.f32 1.0, %v581_v30 }
 0x2e4   :  { %v362_v33 = vadd.f32 1.0, %v583_v31 }
 0x2e5   :  { %588 = vrcp.f32 %v361_v32 }
 0x2e6   :  { %v585_v34 = vpop.eup %584  ;;  %590 = vrcp.f32 %v362_v33 }
 0x2e7   :  { %v587_v35 = vpop.eup %586  ;;  %v363_v36 = vadd.f32 1.0, %v585_v34 }
 0x2e8   :  { %v364_v37 = vadd.f32 1.0, %v587_v35 }
 0x2e9   :  { %592 = vrcp.f32 %v363_v36 }
 0x2ea   :  { %594 = vrcp.f32 %v364_v37 }
 0x2ef   :  { %v589_v38 = vpop.eup %588 }
 0x2f0   :  { %v591_v39 = vpop.eup %590 }
 0x2f3   :  { %v593_v40 = vpop.eup %592 }
 0x2f4   :  { %v595_v41 = vpop.eup %594  ;;  %v545_v42 = vpack.c.bf16 %v593_v40, %v589_v38 }
 0x2f5   :  { %v543_v43 = vpack.c.bf16 %v595_v41, %v591_v39 }
 0x2f7   :  { %544 = vmatprep.subr.bf16.mxu0 %v543_v43  ;;  %547 = vmatprep.subr.bf16.mxu1 %v543_v43 }
 0x2f8   :  { %546 = vmatpush1.bf16.msra.mxu0 %v545_v42  ;;  %548 = vmatpush1.bf16.msra.mxu1 %v545_v42 }
 0x2fb   :  { %527 = vmatmul.mubr.msk.f32.vlgmr.msra.gmra.mrb[4].mxu0 %vm166_vm1, %v369_v44  ;;  %529 = vmatmul.mubr.msk.f32.vlgmr.msra.gmra.mrb[6].mxu1 %vm166_vm1, %v371_v45 }
 0x2fc   :  { %479 = vmatprep.mubr.f32.mxu0 %v620_v7  ;;  %491 = vmatprep.mubr.f32.mxu1 %v620_v7 }
 0x2ff   :  { %528 = vmatmul.mubr.msk.f32.gmra.mrb[6].mxu0 %vm166_vm1, %v370_v46  ;;  %530 = vmatmul.mubr.msk.f32.gmra.mrb[8].mxu1 %vm166_vm1, %v372_v47 }
 0x3ce   :  { %v475_v51 = vpop.f32.mrb[4].mxu0  ;;  %v487_v52 = vpop.f32.mrb[6].mxu1 }
 0x3cf   :  { %v476_v53 = vadd.f32 %v475_v51, %v380_v48  ;;  %v488_v54 = vadd.f32 %v487_v52, %v390_v50  ;;  %v477_v7 = vpop.f32.mrb[5].mxu0  ;;  %v489_v55 = vpop.f32.mrb[7].mxu1 }
 0x3d0   :  { %v478_v56 = vadd.f32 %v477_v7, %v380_v48  ;;  %v490_v57 = vadd.f32 %v489_v55, %v390_v50 }
 0x3d1   :  { %498 = vst [vmem:[#allocation2] sm:$0xff] %v476_v53  ;;  %502 = vst [vmem:[#allocation2 + $0x20] sm:$0xff] %v488_v54 }
 0x3d2   :  { %499 = vst [vmem:[#allocation2 + $0x8] sm:$0xff] %v478_v56  ;;  %503 = vst [vmem:[#allocation2 + $0x28] sm:$0xff] %v490_v57  ;;  %v481_v59 = vpop.f32.mrb[6].mxu0  ;;  %v493_v60 = vpop.f32.mrb[8].mxu1 }
 0x3d3   :  { %v482_v61 = vadd.f32 %v481_v59, %v385_v49  ;;  %v494_v62 = vadd.f32 %v493_v60, %v395_v58  ;;  %v483_v63 = vpop.f32.mrb[7].mxu0  ;;  %v495_v0 = vpop.f32.mrb[9].mxu1 }
 0x3d4   :  { %v484_v1 = vadd.f32 %v483_v63, %v385_v49  ;;  %v496_v2 = vadd.f32 %v495_v0, %v395_v58 }
 0x3d5   :  { %500 = vst [vmem:[#allocation2 + $0x10] sm:$0xff] %v482_v61  ;;  %504 = vst [vmem:[#allocation2 + $0x30] sm:$0xff] %v494_v62 }
 0x3d6   :  { %501 = vst [vmem:[#allocation2 + $0x18] sm:$0xff] %v484_v1  ;;  %505 = vst [vmem:[#allocation2 + $0x38] sm:$0xff] %v496_v2 }
 0x3d7   :  { %607 = shalt.err (!%p604_p4)
}
 0x3d8   :  { %s608_s13 = scalar_lea.hbm %s788_s9, 1024 }
 0x3d9   :  { %p609_p5 = scmp.ne.s32.totalorder %s788_s9, %s608_s13  ;;  %p612_p6 = scmp.lt.u32.totalorder %s608_s13, %s788_s9 }
 0x3db   :  { %p614_p7 = pnand %p612_p6, %p609_p5 }
 0x3dd   :  { %617 = shalt.err (!%p614_p7)
}
 0x3de   :  { %s623_s1 = smov 256   ;;  %s624_s18 = smov 16  }
 0x3df   :  { %517 = dma.vmem_to_hbm [thread:$0]  %s512_s11, 1024, %s788_s9, [#allocation3], %s623_s1, %s623_s1, %s624_s18  }
 0x3e0   :  { %618 = dma.done.wait [#allocation3], 1024  }
 0x3e1   :  { %619 = vsyncadd [#allocation3], 4294966272 }
 0x3e2   :  { %521 = vsyncpa [#allocation3], 1 }

</bundles_post_ra>
